<compile_context>
chip_gen: v6e
topology: v6e:2x2x1
jax: 0.10.0
libtpu: 0.0.40
codegen_flags: <defaults>
</compile_context>

<pallas_src>
import functools

import jax
import jax.numpy as jnp
from jax.experimental import pallas as pl
from jax.experimental.pallas import tpu as pltpu


def _se_kernel(x_ref, w1_ref, b1_ref, w2_ref, b2_ref, o_ref, *, inv_hw, bn):
    # x_ref / o_ref: (bn, C, HW) in the I/O dtype (bf16/f32); weights/biases in f32.
    w1 = w1_ref[...]            # (se, C)
    b1 = b1_ref[...]            # (se, 1)
    w2 = w2_ref[...]            # (C, se)
    b2 = b2_ref[...]            # (C, 1)

    def one_elem(b):
        xb = x_ref[b]                                    # (C, HW), I/O dtype
        xbf = xb.astype(jnp.float32)                     # one element only, NOT the block
        # adaptive_avg_pool2d -> global mean over spatial dims (exact f32 accumulation;
        # the lane padding beyond HW is masked by the logical shape).
        pooled = jnp.sum(xbf, axis=1, keepdims=True) * inv_hw                # (C, 1)
        # dim_reduce: 1x1 conv == (se, C) @ (C, 1) + bias, then ReLU.
        h = jnp.dot(w1, pooled, preferred_element_type=jnp.float32,
                    precision=jax.lax.Precision.HIGHEST) + b1               # (se, 1)
        h = jnp.maximum(h, 0.0)
        # dim_restore: (C, se) @ (se, 1) + bias, then sigmoid.
        g = jnp.dot(w2, h, preferred_element_type=jnp.float32,
                    precision=jax.lax.Precision.HIGHEST) + b2               # (C, 1)
        g = jax.nn.sigmoid(g)
        # Apply the gate in f32 (don't quantize the gate to bf16); cast only at the store.
        o_ref[b] = (xbf * g).astype(o_ref.dtype)

    if bn <= 8:
        for b in range(bn):                  # short static loop: fully unrolled
            one_elem(b)
    else:
        def body(b, carry):
            one_elem(b)
            return carry
        jax.lax.fori_loop(0, bn, body, 0)


def _vmem_capacity_bytes(default=64 << 20):
    try:
        cap = getattr(pltpu.get_tpu_info(), "vmem_capacity_bytes", None)
        if cap:
            return int(cap)
    except Exception:
        pass
    return default


def squeeze_excitate(x, w_reduce, b_reduce, w_restore, b_restore):
    """x: (N, C, H, W) in bf16 or f32.  PyTorch conv layouts: w_reduce (se, C, 1, 1),
       b_reduce (se,), w_restore (C, se, 1, 1), b_restore (C,)."""
    N, C, H, W = x.shape
    se = w_reduce.shape[0]
    HW = H * W

    x_flat = x.reshape(N, C, HW)                              # zero-copy, NO padding

    # Tiny glue: 1x1-conv weights as f32 matrices in their natural (out, in) layout.
    w1 = w_reduce.reshape(se, C).astype(jnp.float32)          # (se, C)
    b1 = b_reduce.reshape(se, 1).astype(jnp.float32)          # (se, 1)
    w2 = w_restore.reshape(C, se).astype(jnp.float32)         # (C, se)
    b2 = b_restore.reshape(C, 1).astype(jnp.float32)          # (C, 1)

    # --- generation-aware block sizing ------------------------------------------------
    itemsize = jnp.dtype(x.dtype).itemsize
    sublane = max(8, 32 // itemsize)                          # 8 (f32) / 16 (bf16)
    c_pad = -(-C // sublane) * sublane
    hw_pad = -(-HW // 128) * 128
    elem_vmem = c_pad * hw_pad * itemsize                     # VMEM footprint per element
    elem_f32 = (-(-C // 8) * 8) * hw_pad * 4                  # one-element f32 temp

    vmem_cap = _vmem_capacity_bytes()
    # ~8 MiB blocks on v7x (64 MiB VMEM), ~16 MiB on v5e/v6e (128 MiB VMEM).
    target_block = min(16 << 20, max(2 << 20, vmem_cap // 8))
    bn = max(1, min(N, target_block // max(elem_vmem, 1)))
    if N >= 2 and pl.cdiv(N, bn) < 2:                         # >=2 steps for v7x megacore
        bn = pl.cdiv(N, 2)
    grid = (pl.cdiv(N, bn),)                                  # ragged last block is OK
    # TODO(synk): if a single element's C*HW slab alone exceeds the VMEM budget (possible
    # on v7x's 64 MiB), tile HW inside the block with a two-pass pool-then-scale.

    # Explicit VMEM budget: double-buffered in + out blocks, a few one-element f32 temps,
    # weights, slack — capped below physical VMEM to leave compiler headroom.
    block_vmem = bn * elem_vmem
    weight_bytes = 4 * (2 * C * se + se + C)
    vmem_limit = 4 * block_vmem + 3 * elem_f32 + weight_bytes + (2 << 20)
    vmem_limit = int(min(max(vmem_limit, 16 << 20), max(vmem_cap - (8 << 20), 16 << 20)))

    kernel = functools.partial(_se_kernel, inv_hw=1.0 / float(HW), bn=bn)

    out = pl.pallas_call(
        kernel,
        out_shape=jax.ShapeDtypeStruct((N, C, HW), x.dtype),
        grid_spec=pltpu.PrefetchScalarGridSpec(
            num_scalar_prefetch=0,
            grid=grid,
            in_specs=[
                pl.BlockSpec((bn, C, HW), lambda i: (i, 0, 0)),
                pl.BlockSpec((se, C), lambda i: (0, 0)),
                pl.BlockSpec((se, 1), lambda i: (0, 0)),
                pl.BlockSpec((C, se), lambda i: (0, 0)),
                pl.BlockSpec((C, 1), lambda i: (0, 0)),
            ],
            out_specs=pl.BlockSpec((bn, C, HW), lambda i: (i, 0, 0)),
        ),
        compiler_params=pltpu.CompilerParams(
            dimension_semantics=("parallel",),
            vmem_limit_bytes=vmem_limit,
        ),
    )(x_flat, w1, b1, w2, b2)

    return out.reshape(N, C, H, W)                            # zero-copy


def _reference(x, w_reduce, b_reduce, w_restore, b_restore):
    # Pure-JAX reference mirroring the PyTorch forward (f32).
    x = x.astype(jnp.float32)
    se = w_reduce.shape[0]
    C = x.shape[1]
    pooled = jnp.mean(x, axis=(2, 3), keepdims=True)                          # (N,C,1,1)
    h = jnp.einsum("ncij,sc->nsij", pooled, w_reduce.reshape(se, C)) \
        + b_reduce.reshape(1, se, 1, 1)
    h = jax.nn.relu(h)
    g = jnp.einsum("nsij,cs->ncij", h, w_restore.reshape(C, se)) \
        + b_restore.reshape(1, C, 1, 1)
    g = jax.nn.sigmoid(g)
    return x * g


if __name__ == "__main__":
    key = jax.random.PRNGKey(0)
    k_x, k_w1, k_b1, k_w2, k_b2 = jax.random.split(key, 5)

    N, C, H, W = 2, 4, 16, 16
    se_size = 2  # typical SE reduction

    x = jax.random.normal(k_x, (N, C, H, W), dtype=jnp.float32)
    w_reduce = jax.random.normal(k_w1, (se_size, C, 1, 1), dtype=jnp.float32) * 0.1
    b_reduce = jax.random.normal(k_b1, (se_size,), dtype=jnp.float32) * 0.1
    w_restore = jax.random.normal(k_w2, (C, se_size, 1, 1), dtype=jnp.float32) * 0.1
    b_restore = jax.random.normal(k_b2, (C,), dtype=jnp.float32) * 0.1

    # f32 I/O path — tight tolerance against the pure-JAX reference.
    out = jax.block_until_ready(
        squeeze_excitate(x, w_reduce, b_reduce, w_restore, b_restore))
    ref = _reference(x, w_reduce, b_reduce, w_restore, b_restore)
    assert out.shape == (N, C, H, W)
    assert out.dtype == jnp.float32
    assert jnp.allclose(out, ref, atol=1e-5, rtol=1e-5), "f32 mismatch vs reference"

    # bf16 I/O path (native-dtype HBM traffic, f32 gate) — loose tolerance.
    x_bf16 = x.astype(jnp.bfloat16)
    out_bf16 = jax.block_until_ready(
        squeeze_excitate(x_bf16, w_reduce, b_reduce, w_restore, b_restore))
    ref_bf16 = _reference(x_bf16.astype(jnp.float32), w_reduce, b_reduce,
                          w_restore, b_restore)
    assert out_bf16.dtype == jnp.bfloat16
    assert jnp.allclose(out_bf16.astype(jnp.float32), ref_bf16,
                        atol=1e-2, rtol=1e-2), "bf16 mismatch vs reference"

    # Non-divisor batch + non-128-multiple HW (ragged last block, masked tail stores).
    N2, C2, H2, W2, se2 = 3, 8, 7, 7, 4
    k2 = jax.random.split(jax.random.PRNGKey(1), 5)
    x2 = jax.random.normal(k2[0], (N2, C2, H2, W2), dtype=jnp.float32)
    wr2 = jax.random.normal(k2[1], (se2, C2, 1, 1), dtype=jnp.float32) * 0.1
    br2 = jax.random.normal(k2[2], (se2,), dtype=jnp.float32) * 0.1
    ws2 = jax.random.normal(k2[3], (C2, se2, 1, 1), dtype=jnp.float32) * 0.1
    bs2 = jax.random.normal(k2[4], (C2,), dtype=jnp.float32) * 0.1
    out2 = jax.block_until_ready(squeeze_excitate(x2, wr2, br2, ws2, bs2))
    ref2 = _reference(x2, wr2, br2, ws2, bs2)
    assert jnp.allclose(out2, ref2, atol=1e-5, rtol=1e-5), "ragged-batch mismatch"

    print("KERNEL_OK")
</pallas_src>

<mosaic_0001>
module attributes {stable_mosaic.version = 11 : i64} {
  func.func @_se_kernel(%arg0: i32, %arg1: memref<1x4x256xf32, #tpu.memory_space<vmem>>, %arg2: memref<2x4xf32, #tpu.memory_space<vmem>>, %arg3: memref<2x1xf32, #tpu.memory_space<vmem>>, %arg4: memref<4x2xf32, #tpu.memory_space<vmem>>, %arg5: memref<4x1xf32, #tpu.memory_space<vmem>>, %arg6: memref<1x4x256xf32, #tpu.memory_space<vmem>>) attributes {dimension_semantics = [#tpu.dimension_semantics<parallel>], iteration_bounds = array<i64: 2>, scalar_prefetch = 0 : i64, scratch_operands = 0 : i64, tpu.core_type = #tpu.core_type<tc>, window_params = [{transform_indices = @transform_0, window_bounds = array<i64: 1, 4, 256>}, {pipeline_mode = #tpu.pipeline_mode<synchronous>, transform_indices = @transform_1, window_bounds = array<i64: 2, 4>}, {pipeline_mode = #tpu.pipeline_mode<synchronous>, transform_indices = @transform_2, window_bounds = array<i64: 2, 1>}, {pipeline_mode = #tpu.pipeline_mode<synchronous>, transform_indices = @transform_3, window_bounds = array<i64: 4, 2>}, {pipeline_mode = #tpu.pipeline_mode<synchronous>, transform_indices = @transform_4, window_bounds = array<i64: 4, 1>}, {transform_indices = @transform_5, window_bounds = array<i64: 1, 4, 256>}]} {
    %c0 = arith.constant 0 : index
    %c0_0 = arith.constant 0 : index
    %0 = vector.load %arg2[%c0, %c0_0] : memref<2x4xf32, #tpu.memory_space<vmem>>, vector<2x4xf32>
    %c0_1 = arith.constant 0 : index
    %c0_2 = arith.constant 0 : index
    %1 = vector.load %arg3[%c0_1, %c0_2] : memref<2x1xf32, #tpu.memory_space<vmem>>, vector<2x1xf32>
    %c0_3 = arith.constant 0 : index
    %c0_4 = arith.constant 0 : index
    %2 = vector.load %arg4[%c0_3, %c0_4] : memref<4x2xf32, #tpu.memory_space<vmem>>, vector<4x2xf32>
    %c0_5 = arith.constant 0 : index
    %c0_6 = arith.constant 0 : index
    %3 = vector.load %arg5[%c0_5, %c0_6] : memref<4x1xf32, #tpu.memory_space<vmem>>, vector<4x1xf32>
    %c0_7 = arith.constant 0 : index
    %c0_8 = arith.constant 0 : index
    %c0_9 = arith.constant 0 : index
    %4 = vector.load %arg1[%c0_7, %c0_8, %c0_9] : memref<1x4x256xf32, #tpu.memory_space<vmem>>, vector<1x4x256xf32>
    %5 = vector.shape_cast %4 : vector<1x4x256xf32> to vector<4x256xf32>
    %cst = arith.constant dense<0.000000e+00> : vector<4xf32>
    %6 = vector.multi_reduction <add>, %5, %cst [1] : vector<4x256xf32> to vector<4xf32>
    %7 = vector.shape_cast %6 : vector<4xf32> to vector<4x1xf32>
    %cst_10 = arith.constant 3.906250e-03 : f32
    %8 = vector.broadcast %cst_10 : f32 to vector<4x1xf32>
    %9 = arith.mulf %7, %8 : vector<4x1xf32>
    %cst_11 = arith.constant dense<0.000000e+00> : vector<2x1xf32>
    %10 = tpu.matmul %0, %9, %cst_11 {dimension_numbers = #tpu.dot_dimension_numbers<[1], [0], [0], [1], [0, 0, 1, 1], [], []>, precision = #tpu.contract_precision<fp32>} : vector<2x4xf32>, vector<4x1xf32>, vector<2x1xf32> -> vector<2x1xf32>
    %11 = arith.addf %10, %1 : vector<2x1xf32>
    %cst_12 = arith.constant 0.000000e+00 : f32
    %12 = vector.broadcast %cst_12 : f32 to vector<2x1xf32>
    %13 = arith.maximumf %11, %12 : vector<2x1xf32>
    %cst_13 = arith.constant dense<0.000000e+00> : vector<4x1xf32>
    %14 = tpu.matmul %2, %13, %cst_13 {dimension_numbers = #tpu.dot_dimension_numbers<[1], [0], [0], [1], [0, 0, 1, 1], [], []>, precision = #tpu.contract_precision<fp32>} : vector<4x2xf32>, vector<2x1xf32>, vector<4x1xf32> -> vector<4x1xf32>
    %15 = arith.addf %14, %3 : vector<4x1xf32>
    %16 = arith.negf %15 : vector<4x1xf32>
    %17 = math.exp %16 : vector<4x1xf32>
    %cst_14 = arith.constant 1.000000e+00 : f32
    %18 = vector.broadcast %cst_14 : f32 to vector<4x1xf32>
    %19 = arith.addf %18, %17 : vector<4x1xf32>
    %20 = arith.divf %18, %19 : vector<4x1xf32>
    %21 = vector.broadcast %20 : vector<4x1xf32> to vector<4x256xf32>
    %22 = arith.mulf %5, %21 : vector<4x256xf32>
    %c0_15 = arith.constant 0 : index
    %c0_16 = arith.constant 0 : index
    %c0_17 = arith.constant 0 : index
    %23 = vector.load %arg6[%c0_15, %c0_16, %c0_17] : memref<1x4x256xf32, #tpu.memory_space<vmem>>, vector<1x4x256xf32>
    %24 = vector.shape_cast %23 : vector<1x4x256xf32> to vector<4x256xf32>
    %25 = vector.shape_cast %22 : vector<4x256xf32> to vector<1x4x256xf32>
    tpu.vector_store %arg6[%c0_15, %c0_16, %c0_17], %25 {strides = array<i32>} : memref<1x4x256xf32, #tpu.memory_space<vmem>>, vector<1x4x256xf32>,
    return
  }
  func.func @transform_0(%arg0: i32) -> (i32, i32, i32) {
    %c0_i32 = arith.constant 0 : i32
    %c0_i32_0 = arith.constant 0 : i32
    %c0_i32_1 = arith.constant 0 : i32
    return %arg0, %c0_i32, %c0_i32_0 : i32, i32, i32
  }
  func.func @transform_1(%arg0: i32) -> (i32, i32) {
    %c0_i32 = arith.constant 0 : i32
    %c0_i32_0 = arith.constant 0 : i32
    %c0_i32_1 = arith.constant 0 : i32
    return %c0_i32, %c0_i32_0 : i32, i32
  }
  func.func @transform_2(%arg0: i32) -> (i32, i32) {
    %c0_i32 = arith.constant 0 : i32
    %c0_i32_0 = arith.constant 0 : i32
    %c0_i32_1 = arith.constant 0 : i32
    return %c0_i32, %c0_i32_0 : i32, i32
  }
  func.func @transform_3(%arg0: i32) -> (i32, i32) {
    %c0_i32 = arith.constant 0 : i32
    %c0_i32_0 = arith.constant 0 : i32
    %c0_i32_1 = arith.constant 0 : i32
    return %c0_i32, %c0_i32_0 : i32, i32
  }
  func.func @transform_4(%arg0: i32) -> (i32, i32) {
    %c0_i32 = arith.constant 0 : i32
    %c0_i32_0 = arith.constant 0 : i32
    %c0_i32_1 = arith.constant 0 : i32
    return %c0_i32, %c0_i32_0 : i32, i32
  }
  func.func @transform_5(%arg0: i32) -> (i32, i32, i32) {
    %c0_i32 = arith.constant 0 : i32
    %c0_i32_0 = arith.constant 0 : i32
    %c0_i32_1 = arith.constant 0 : i32
    return %arg0, %c0_i32, %c0_i32_0 : i32, i32, i32
  }
}

</mosaic_0001>

<bundles_post_ra>
// kernel: tpu_custom_call.1
= control target key start
LH: loop header
LB: loop body
LE: loop exit
PB: predicated region body
PF: predicated region fallthrough
CT: control target
= control target key end

     0   :  { %10 = vsyncpa [#allocation3], 0  ;;  %s1758_s0 = inlined_call_operand.hbm [shape: f32[2,4,256], index: 0, kind: input, shape index: {}]   ;;  %s1759_s1 = inlined_call_operand.vmem [shape: f32[2,4], index: 1, kind: input, shape index: {}]   ;;  %s1760_s2 = inlined_call_operand.vmem [shape: f32[2,1], index: 2, kind: input, shape index: {}]   ;;  %s1761_s3 = inlined_call_operand.vmem [shape: f32[4,2], index: 3, kind: input, shape index: {}]   ;;  %s1762_s4 = inlined_call_operand.vmem [shape: f32[4,1], index: 4, kind: input, shape index: {}]   ;;  %s1763_s5 = inlined_call_operand.hbm [shape: f32[2,4,256], index: 5, kind: output, shape index: {}]  }
   0x1   :  { %12 = vsyncpa [#allocation3 + $0x1], 0 }
   0x2   :  { %13 = vsyncpa [#allocation4], 0 }
   0x3   :  { %15 = vsyncpa [#allocation4 + $0x1], 0  ;;  %s1556_s18 = smov 0   ;;  %s1558_s19 = smov 0  }
   0x4   :  { %s1560_s20 = smov 0   ;;  %s1562_s21 = smov 0  }
   0x5 LB: > { %s1577_s22 = sadd.s32 4294967295, %s1518_s21   ;;  %s1269_s23 = sadd.s32 4294967294, %s1518_s21   ;;  %s1518_s21 = sphi %s1562_s21, %s1780_s21   ;;  %s1514_s20 = sphi %s1560_s20, %s1779_s20   ;;  %s1510_s19 = sphi %s1558_s19, %s1778_s19   ;;  %s1506_s18 = sphi %s1556_s18, %s1777_s18  }
   0x6   : > { %s1581_s24 = sadd.s32 1, %s1518_s21   ;;  %s28_s25 = sadd.s32 1, %s1514_s20 }
   0x7   : > { %s25_s26 = ssub.s32 %s1518_s21, %s1581_s24  ;;  %p35_p0 = scmp.ne.s32.totalorder %s1514_s20, %s1510_s19 }
   0x8   : > { %p26_p1 = scmp.eq.s32.totalorder %s25_s26, 0  ;;  %p36_p2 = scmp.eq.s32.totalorder %s1518_s21, 0 }
   0x9   : > { %p41_p3 = scmp.ne.s32.totalorder %s1510_s19, %s1506_s18  ;;  %p42_p4 = scmp.eq.s32.totalorder %s1577_s22, 0 }
   0xa   : > { %s1593_s27 = scalar_select %p26_p1, %s1514_s20, %s28_s25  }
   0xb   : > { %p1595_p5 = por %p36_p2, %p35_p0  ;;  %p1599_p6 = por %p42_p4, %p41_p3 }
   0xc   : > { %p149_p7 = scmp.eq.s32.totalorder %s1577_s22, 1  ;;  %p155_p8 = scmp.eq.s32.totalorder %s1269_s23, 1 }
   0xd   : > { %s1767_s29 = scalar_select %p1599_p6, 1, 0 }
   0xe   : > { %p1382_p10 = scmp.lt.s32.totalorder %s1518_s21, 2  ;;  %p1606_p11 = por %p149_p7, %p35_p0 }
   0xf   : > { %p1610_p12 = por %p155_p8, %p41_p3  ;;  %s187_s7 = sand.u32 1, %s1514_s20  }
  0x10   : > { %s1768_s30 = scalar_select %p1606_p11, 1, 0 }
  0x11   : > { %s1769_s6 = scalar_select %p1610_p12, 1, 0 }
  0x12   : > { %s1284_s8 = sshll.u32 %s1518_s21, 7  ;;  %s1272_s9 = sshll.u32 %s187_s7, 3 }
  0x13   : > { %s1619_s12 = scalar_lea.hbm %s1758_s0, %s1284_s8  ;;  %s191_s13 = scalar_lea.vmem [#allocation2], %s1272_s9 }
  0x14   : > { %s199_s14 = sshll.u32 %s191_s13, 4  ;;  %p1623_p13 = pnand %p1382_p10, %p1595_p5  ;;  %s1627_s14 = int_to_ptr.vmem [resolvable:$true] %s199_s14 }
  0x15   : > { %s188_s16 = scalar_lea.sflag [#allocation3], %s187_s7  ;;  %s1426_s17 = scalar_lea.hbm %s1619_s12, 128 }
  0x16   : > { %p1427_p2 = scmp.ne.s32.totalorder %s1619_s12, %s1426_s17  ;;  %p1428_p3 = pneg %p1623_p13 }
  0x17   : > { %s1431_s26 = scalar_lea.hbm %s1758_s0, 256  ;;  %p1432_p5 = scmp.lt.s32.totalorder %s1619_s12, %s1758_s0 }
  0x18   : > { %p1429_p4 = pnand %p1428_p3, %p1427_p2  ;;  %p1433_p8 = scmp.lt.s32.totalorder %s1431_s26, %s1426_s17 }
  0x1a   : > { %p1430_p7 = pneg %p1429_p4  ;;  %p1434_p10 = por %p1433_p8, %p1432_p5 }
  0x1c   : > { %p1435_p9 = pnand %p1434_p10, %p1430_p7 }
  0x1e   : > { %1438 = shalt.err (!%p1435_p9)
}
  0x1f   : > { %s1439_s7 = scalar_lea.vmem %s1627_s14, 128  ;;  %s1520_s9 = smov [#allocation2]  }
  0x20   : > { %p1440_p0 = scmp.ne.s32.totalorder %s1627_s14, %s1439_s7  ;;  %s1444_s10 = sshll.u32 %s1520_s9, 4  ;;  %s1445_s10 = int_to_ptr.vmem [resolvable:$false] %s1444_s10 }
  0x21   : > { %s1446_s11 = scalar_lea.vmem %s1445_s10, 256  ;;  %p1447_p4 = scmp.lt.s32.totalorder %s1627_s14, %s1445_s10 }
  0x22   : > { %p1442_p1 = pnand %p1440_p0, %p1428_p3  ;;  %p1448_p12 = scmp.lt.s32.totalorder %s1446_s11, %s1439_s7 }
  0x24   : > { %p1443_p2 = pneg %p1442_p1  ;;  %p1449_p11 = por %p1448_p12, %p1447_p4 }
  0x26   : > { %p1450_p6 = pnand %p1449_p11, %p1443_p2 }
  0x28   : > { %1453 = shalt.err (!%p1450_p6)
}
  0x29   : > { %1377 = dma.hbm_to_vmem [thread:$0]  (!%p1623_p13), %s1619_s12, 128, %s1627_s14, %s188_s16  }
  0x2a   : > { %p1771_p9 = scmp.lt.s32.totalorder %s1518_s21, 3  ;;  %p1772_p7 = scmp.ge.s32.totalorder %s1518_s21, 1 }
  0x2c   : > { %p205_p0 = pnand %p1772_p7, %p1771_p9 }
  0x2d   : > { %s1654_s13 = sand.u32 (!%p205_p0), 1, %s1510_s19   ;;  %p1773_p6 = scmp.ne.s32.totalorder (!%p205_p0), %s1767_s29, 0 }
  0x2e   : > { %208 = sbr.rel (%p205_p0) target bundleno = 803 (0x323), region = 40  ;;  %s1276_s17 = sshll.u32 (!%p205_p0), %s1654_s13, 3 }
  0x2f   : > { %s211_s23 = scalar_lea.sflag (!%p205_p0), [#allocation3], %s1654_s13  ;;  %s214_s15 = scalar_lea.vmem (!%p205_p0), [#allocation2], %s1276_s17 }
  0x33   : > { %1497 = dma.done.wait (%p1773_p6), %s211_s23, 128  }
  0x34   : > { %1499 = vsyncadd (%p1773_p6), %s211_s23, 4294967168  ;;  %vm249_vm0 = vcmask 1043456   ;;  %v1664_v0 = vld [vmem:[%s214_s15] sm:$0xff]  ;;  %v1521_v5 = vmov 0.0   ;;  %vm1522_vm1 = vmmov 0   ;;  %vm256_vm2 = vcmask 31744  }
  0x35   : > { %v247_v1 = vcombine.high %v1664_v0, %v1664_v0  ;;  %v250_v2 = vsel %vm249_vm0, %v1664_v0, 0.0  ;;  %1310 = vmatprep.subr.mxu0 %v1521_v5  ;;  %1315 = vmatprep.subr.mxu1 %v1521_v5  ;;  %v241_v6 = vld [vmem:[%s1759_s1] sm:$0x3]  ;;  %vm710_vm3 = vcmask 15360   ;;  %vm714_vm4 = vcmask 1041408   ;;  %s1285_s7 = sshll.u32 %s1577_s22, 7 }
  0x36   : > { %1312 = vmatprep.mubr.msk.f32.mxu0 %vm1522_vm1, %v1521_v5  ;;  %1317 = vmatprep.mubr.msk.f32.mxu1 %vm1522_vm1, %v1521_v5  ;;  %v258_v7 = vsel %vm256_vm2, %v241_v6, 0  ;;  %v243_v21 = vld [vmem:[%s1761_s3] sm:$0xf]  ;;  %v1523_v54 = vmov 0   ;;  %s240_s9 = scalar_lea.vmem [#allocation5], %s1276_s17  ;;  %s1197_s15 = scalar_lea.hbm %s1763_s5, %s1285_s7 }
  0x37   : > { %v251_v3 = vsel %vm249_vm0, %v247_v1, 0.0  ;;  %v329_v8 = vand.u32 4294901760, %v258_v7  ;;  %v242_v23 = vld [vmem:[%s1760_s2] sm:$0x3]  ;;  %v712_v25 = vsel %vm710_vm3, %v243_v21, 0  ;;  %1420 = vset.pattern.permute.xlu0 %v1523_v54  ;;  %s1199_s10 = sshll.u32 %s240_s9, 4  ;;  %s1200_s10 = int_to_ptr.vmem [resolvable:$true] %s1199_s10 }
  0x38   : > { %v252_v4 = vadd.f32 %v251_v3, %v250_v2  ;;  %v784_v28 = vand.u32 4294901760, %v712_v25  ;;  %v244_v56 = vld [vmem:[%s1762_s4] sm:$0xf]  ;;  %s1185_s29 = scalar_lea.sflag [#allocation4], %s1654_s13  ;;  %s1454_s12 = scalar_lea.vmem %s1200_s10, 128 }
  0x39   : > { %v330_v9 = vsub.f32 %v258_v7, %v329_v8  ;;  %p1455_p11 = scmp.ne.s32.totalorder %s1200_s10, %s1454_s12  ;;  %p1774_p12 = scmp.ne.s32.totalorder %s1768_s30, 0 }
  0x3a   : > { %253 = vadd.xlane.f32.xlu0 %v252_v4  ;;  %v785_v32 = vsub.f32 %v712_v25, %v784_v28  ;;  %s1525_s14 = smov [#allocation5]  }
  0x3b   : > { %v331_v10 = vand.u32 4294901760, %v330_v9  ;;  %p1456_p13 = pnand %p1455_p11, %p1774_p12  ;;  %s1458_s22 = sshll.u32 %s1525_s14, 4  ;;  %s1459_s22 = int_to_ptr.vmem [resolvable:$false] %s1458_s22 }
  0x3c   : > { %v786_v39 = vand.u32 4294901760, %v785_v32  ;;  %s1460_s17 = scalar_lea.vmem %s1459_s22, 256  ;;  %p1461_p3 = scmp.lt.s32.totalorder %s1200_s10, %s1459_s22 }
  0x3d   : > { %v332_v11 = vsub.f32 %v330_v9, %v331_v10  ;;  %p1457_p1 = pneg %p1456_p13  ;;  %p1462_p5 = scmp.lt.s32.totalorder %s1460_s17, %s1454_s12 }
  0x3e   : > { %v787_v44 = vsub.f32 %v785_v32, %v786_v39 }
  0x3f   : > { %v333_v15 = vand.u32 4294901760, %v332_v11  ;;  %p1463_p8 = por %p1462_p5, %p1461_p3 }
  0x40   : > { %v788_v48 = vand.u32 4294901760, %v787_v44 }
  0x41   : > { %p1464_p10 = pnand %p1463_p8, %p1457_p1 }
  0xc3   : > { %v254_v12 = vpop.xlane.xlu0 %253 }
  0xc4   : > { %v255_v13 = vmul.f32 0.00390625, %v254_v12 }
  0xc6   : > { %v261_v14 = vsel %vm249_vm0, %v255_v13, 0 }
  0xc7   : > { %v294_v16 = vand.u32 4294901760, %v261_v14 }
  0xc9   : > { %v371_v17 = vsub.f32 %v261_v14, %v294_v16  ;;  %1311 = vmatpush3.msra.mxu0 %v294_v16 }
  0xca   : > { %1313 = vmatmul.mubr.f32.vlgmr.msra.gmra.mxu0 %v333_v15  ;;  %1320 = vmatprep.subr.mxu0 %v1521_v5  ;;  %v1524_v15 = vmov 839922192  }
  0xcb   : > { %1321 = vmatpush3.msra.mxu0 %v371_v17  ;;  %1322 = vmatprep.mubr.msk.f32.mxu0 %vm1522_vm1, %v1521_v5  ;;  %v372_v18 = vand.u32 4294901760, %v371_v17 }
  0xcc   : > { %1330 = vmatprep.subr.mxu0 %v1521_v5 }
  0xcd   : > { %v373_v19 = vsub.f32 %v371_v17, %v372_v18  ;;  %v1177_v17 = vlaneseq }
  0xce   : > { %1323 = vmatmul.mubr.f32.vlgmr.msra.gmra.mxu0 %v330_v9 }
  0xcf   : > { %1331 = vmatpush3.msra.mxu0 %v372_v18  ;;  %v374_v20 = vand.u32 4294901760, %v373_v19  ;;  %1332 = vmatprep.mubr.msk.f32.mxu0 %vm1522_vm1, %v1521_v5  ;;  %v1178_v19 = vshrl.u32 %v1177_v17, 7 }
  0xd0   : > { %1340 = vmatprep.subr.mxu0 %v1521_v5 }
  0xd1   : > { %1316 = vmatpush3.msra.mxu1 %v374_v20 }
  0xd2   : > { %1318 = vmatmul.mubr.f32.vlgmr.msra.gmra.mxu1 %v329_v8  ;;  %1325 = vmatprep.subr.mxu1 %v1521_v5 }
  0xd3   : > { %1326 = vmatpush3.msra.mxu1 %v294_v16  ;;  %1327 = vmatprep.mubr.msk.f32.mxu1 %vm1522_vm1, %v1521_v5 }
  0xd4   : > { %1335 = vmatprep.subr.mxu1 %v1521_v5  ;;  %1333 = vmatmul.mubr.f32.vlgmr.msra.gmra.mxu0 %v329_v8 }
  0xd5   : > { %1342 = vmatprep.mubr.msk.f32.mxu0 %vm1522_vm1, %v1521_v5 }
  0xd6   : > { %1328 = vmatmul.mubr.f32.vlgmr.msra.gmra.mxu1 %v331_v10 }
  0xd7   : > { %1336 = vmatpush3.msra.mxu1 %v294_v16  ;;  %1337 = vmatprep.mubr.msk.f32.mxu1 %vm1522_vm1, %v1521_v5  ;;  %v1175_v16 = vunpack.c.l.s4 %v1524_v15 }
  0xd8   : > { %1345 = vmatprep.subr.mxu1 %v1521_v5 }
  0xd9   : > { %v1176_v18 = vunpack.c.0.s8 %v1175_v16 }
  0xda   : > { %1338 = vmatmul.mubr.f32.vlgmr.msra.gmra.mxu1 %v329_v8 }
  0xdb   : > { %1347 = vmatprep.mubr.msk.f32.mxu1 %vm1522_vm1, %v1521_v5  ;;  %v1179_v20 = vsub.s32 %v1176_v18, %v1178_v19 }
 0x18a   : > { %v335_v22 = vpop.f32.mrf.mxu0 }
 0x18b   : > { %v336_v27 = vadd.f32 %v335_v22, %v242_v23 }
 0x18c   : > { %v1314_v24 = vpop.f32.mrf.mxu0 }
 0x18e   : > { %v485_v26 = vpop.f32.mrf.mxu0 }
 0x190   : > { %v1324_v29 = vpop.f32.mrf.mxu0 }
 0x192   : > { %v411_v30 = vpop.f32.mrf.mxu1 }
 0x193   : > { %v412_v31 = vadd.f32 %v411_v30, %v336_v27 }
 0x194   : > { %v1319_v33 = vpop.f32.mrf.mxu1  ;;  %v633_v34 = vpop.f32.mrf.mxu0 }
 0x195   : > { %v486_v35 = vadd.f32 %v485_v26, %v412_v31 }
 0x196   : > { %v559_v36 = vpop.f32.mrf.mxu1  ;;  %v1334_v37 = vpop.f32.mrf.mxu0 }
 0x197   : > { %v560_v38 = vadd.f32 %v559_v36, %v486_v35 }
 0x198   : > { %v1329_v40 = vpop.f32.mrf.mxu1 }
 0x199   : > { %v634_v41 = vadd.f32 %v633_v34, %v560_v38 }
 0x19a   : > { %v705_v42 = vpop.f32.mrf.mxu1 }
 0x19b   : > { %v706_v43 = vadd.f32 %v705_v42, %v634_v41 }
 0x19c   : > { %v1339_v45 = vpop.f32.mrf.mxu1 }
 0x19d   : > { %v709_v46 = vmax.f32 %v706_v43, 0.0 }
 0x19f   : > { %v716_v47 = vsel %vm714_vm4, %v709_v46, 0 }
 0x1a0   : > { %v749_v49 = vand.u32 4294901760, %v716_v47 }
 0x1a2   : > { %v826_v50 = vsub.f32 %v716_v47, %v749_v49  ;;  %1341 = vmatpush3.msra.mxu0 %v749_v49 }
 0x1a3   : > { %1343 = vmatmul.mubr.f32.vlgmr.msra.gmra.mxu0 %v788_v48  ;;  %1350 = vmatprep.subr.mxu0 %v1521_v5 }
 0x1a4   : > { %1351 = vmatpush3.msra.mxu0 %v826_v50  ;;  %1352 = vmatprep.mubr.msk.f32.mxu0 %vm1522_vm1, %v1521_v5  ;;  %v827_v51 = vand.u32 4294901760, %v826_v50 }
 0x1a5   : > { %1360 = vmatprep.subr.mxu0 %v1521_v5 }
 0x1a6   : > { %v828_v52 = vsub.f32 %v826_v50, %v827_v51 }
 0x1a7   : > { %1353 = vmatmul.mubr.f32.vlgmr.msra.gmra.mxu0 %v785_v32 }
 0x1a8   : > { %1361 = vmatpush3.msra.mxu0 %v827_v51  ;;  %v829_v53 = vand.u32 4294901760, %v828_v52  ;;  %1362 = vmatprep.mubr.msk.f32.mxu0 %vm1522_vm1, %v1521_v5 }
 0x1aa   : > { %1346 = vmatpush3.msra.mxu1 %v829_v53 }
 0x1ab   : > { %1348 = vmatmul.mubr.f32.vlgmr.msra.gmra.mxu1 %v784_v28  ;;  %1355 = vmatprep.subr.mxu1 %v1521_v5 }
 0x1ac   : > { %1356 = vmatpush3.msra.mxu1 %v749_v49  ;;  %1357 = vmatprep.mubr.msk.f32.mxu1 %vm1522_vm1, %v1521_v5 }
 0x1ad   : > { %1365 = vmatprep.subr.mxu1 %v1521_v5  ;;  %1363 = vmatmul.mubr.f32.vlgmr.msra.gmra.mxu0 %v784_v28 }
 0x1af   : > { %1358 = vmatmul.mubr.f32.vlgmr.msra.gmra.mxu1 %v786_v39 }
 0x1b0   : > { %1366 = vmatpush3.msra.mxu1 %v749_v49  ;;  %1367 = vmatprep.mubr.msk.f32.mxu1 %vm1522_vm1, %v1521_v5 }
 0x1b3   : > { %1368 = vmatmul.mubr.f32.vlgmr.msra.gmra.mxu1 %v784_v28 }
 0x263   : > { %v790_v55 = vpop.f32.mrf.mxu0 }
 0x264   : > { %v791_v59 = vadd.f32 %v790_v55, %v244_v56 }
 0x265   : > { %v1344_v57 = vpop.f32.mrf.mxu0 }
 0x267   : > { %v940_v58 = vpop.f32.mrf.mxu0 }
 0x269   : > { %v1354_v60 = vpop.f32.mrf.mxu0 }
 0x26b   : > { %v866_v61 = vpop.f32.mrf.mxu1 }
 0x26c   : > { %v867_v62 = vadd.f32 %v866_v61, %v791_v59 }
 0x26d   : > { %v1349_v63 = vpop.f32.mrf.mxu1  ;;  %v1088_v1 = vpop.f32.mrf.mxu0 }
 0x26e   : > { %v941_v2 = vadd.f32 %v940_v58, %v867_v62 }
 0x26f   : > { %v1014_v3 = vpop.f32.mrf.mxu1  ;;  %v1364_v4 = vpop.f32.mrf.mxu0 }
 0x270   : > { %v1015_v5 = vadd.f32 %v1014_v3, %v941_v2 }
 0x271   : > { %v1359_v6 = vpop.f32.mrf.mxu1 }
 0x272   : > { %v1089_v7 = vadd.f32 %v1088_v1, %v1015_v5 }
 0x273   : > { %v1160_v8 = vpop.f32.mrf.mxu1 }
 0x274   : > { %v1161_v9 = vadd.f32 %v1160_v8, %v1089_v7 }
 0x275   : > { %v1369_v10 = vpop.f32.mrf.mxu1 }
 0x276   : > { %v1278_v11 = vmul.f32 -1.442695, %v1161_v9 }
 0x278   : > { %1422 = vpow2.f32 %v1278_v11 }
 0x285   : > { %v1423_v12 = vpop.eup %1422 }
 0x286   : > { %v1167_v13 = vadd.f32 1.0, %v1423_v12 }
 0x288   : > { %1424 = vrcp.f32 %v1167_v13 }
 0x295   : > { %v1425_v14 = vpop.eup %1424 }
 0x296   : > { %1172 = vperm.xlu0 %1420, %v1425_v14  }
 0x311   : > { %v1173_v21 = vpop.permute.xlu0 %1172 }
 0x312   : > { %v1180_v22 = vrot.slane %v1173_v21, %v1179_v20 }
 0x314   : > { %v1182_v23 = vmul.f32 %v1180_v22, %v1664_v0 }
 0x316   : > { %1183 = vst [vmem:[%s240_s9] sm:$0xff] %v1182_v23 }
 0x317   : > { %1467 = shalt.err (!%p1464_p10)
}
 0x318   : > { %s1468_s16 = scalar_lea.hbm %s1197_s15, 128  ;;  %s1472_s26 = scalar_lea.hbm %s1763_s5, 256 }
 0x319   : > { %p1469_p2 = scmp.ne.s32.totalorder %s1197_s15, %s1468_s16  ;;  %p1473_p7 = scmp.lt.s32.totalorder %s1197_s15, %s1763_s5 }
 0x31a   : > { %p1474_p0 = scmp.lt.s32.totalorder %s1472_s26, %s1468_s16 }
 0x31b   : > { %p1470_p4 = pnand %p1469_p2, %p1774_p12 }
 0x31c   : > { %p1475_p6 = por %p1474_p0, %p1473_p7 }
 0x31d   : > { %p1471_p9 = pneg %p1470_p4 }
 0x31f   : > { %p1476_p11 = pnand %p1475_p6, %p1471_p9 }
 0x321   : > { %1479 = shalt.err (!%p1476_p11)
}
 0x322   : > { %1372 = dma.vmem_to_hbm [thread:$0]  (%p1774_p12), %s1200_s10, 128, %s1197_s15, %s1185_s29  }
 0x323 PF: > { %s1211_s7 = sand.u32 1, %s1506_s18   ;;  %p1775_p13 = scmp.ne.s32.totalorder %s1769_s6, 0 }
 0x324   : > { %p1776_p1 = scmp.ge.s32.totalorder %s1518_s21, 2  ;;  %s1212_s9 = scalar_lea.sflag [#allocation4], %s1211_s7 }
 0x326   : > { %p1379_p3 = pnand %p1776_p1, %p1775_p13 }
 0x328   : > { %p1380_p5 = pneg %p1379_p3 }
 0x32a   : > { %1501 = dma.done.wait (%p1380_p5), %s1212_s9, 128  }
 0x32b   : > { %1503 = vsyncadd (%p1380_p5), %s1212_s9, 4294967168  ;;  %p18_p8 = scmp.ge.s32.totalorder %s1581_s24, 4   ;;  %s1777_s18 = smov %s1510_s19 }
 0x32c   : > { %s1778_s19 = smov %s1514_s20  ;;  %s1779_s20 = smov %s1593_s27 }
 0x32d   : > { %s1780_s21 = smov %s1581_s24  ;;  %20 = sbr.rel (!%p18_p8) target bundleno = 5 (0x5), region = 85 }
 0x332   :  { %1217 = vsyncpa [#allocation3], 1 }
 0x333   :  { %1219 = vsyncpa [#allocation3 + $0x1], 1 }
 0x334   :  { %1220 = vsyncpa [#allocation4], 1 }
 0x335   :  { %1222 = vsyncpa [#allocation4 + $0x1], 1 }

</bundles_post_ra>
